<compile_context>
chip_gen: v7x
topology: tpu7x:2x2x1
jax: 0.10.0
libtpu: 0.0.40
codegen_flags: <defaults>
</compile_context>

<pallas_src>
import functools

import jax
import jax.numpy as jnp
from jax.experimental import pallas as pl
from jax.experimental.pallas import tpu as pltpu

H1 = 128   # fc1 out features (already lane-dense)
H2 = 64    # fc2 out features


def _round_up(x, m):
    return (x + m - 1) // m * m


# ---------------------------------------------------------------------------
# Kernel: one batch tile -> full 3-layer MLP, all in f32.
# ---------------------------------------------------------------------------
def mlp_kernel(x_ref, w_ref, b_ref, o_ref):
    f = x_ref.shape[1]               # real feature count (K of fc1)
    f_pad = w_ref.shape[0] - H1      # sublane-aligned offset of the w2 region

    x = x_ref[...]                   # (tile, F) f32

    # Static, tile-aligned views into the packed parameter slabs (no data movement).
    w1 = w_ref[0:f, :]               # (F, 128)   f32
    w2 = w_ref[f_pad:f_pad + H1, :]  # (128, 128) f32 (cols >= 64 are exactly 0)
    b1 = b_ref[0:1, :]               # (1, 128)   f32
    b2 = b_ref[1:2, :]               # (1, 128)   f32 (cols >= 64 are 0)
    w3 = b_ref[2:3, :]               # (1, 128)   fc3 weight as a row (cols >= 64 are 0)
    # fc3 bias lives in lane 0 of row 3 (rest zero); lane-reduce it to a (1,1) scalar.
    b3 = jnp.sum(b_ref[3:4, :], axis=-1, keepdims=True)

    # fc1 + ReLU   (MXU f32 matmul, bias/relu on VPU)
    h = jnp.maximum(jnp.dot(x, w1, preferred_element_type=jnp.float32) + b1, 0.0)
    # fc2 + ReLU   (padded cols 64..127 stay exactly 0: zero weights + zero bias)
    h = jnp.maximum(jnp.dot(h, w2, preferred_element_type=jnp.float32) + b2, 0.0)
    # fc3: 64 -> 1 as VPU multiply + XLU lane reduction (no 3rd MXU pass,
    # produces the narrow (tile, 1) result directly).
    o_ref[...] = jnp.sum(h * w3, axis=-1, keepdims=True) + b3


# ---------------------------------------------------------------------------
# One-time parameter packing (outside the per-call hot path).
# ---------------------------------------------------------------------------
def pack_params(params, input_size):
    """Pack w1,w2 into one f32 slab; b1,b2,w3-row,b3 into one (8,128) f32 slab."""
    f_pad = _round_up(max(input_size, 1), 8)          # f32 sublane granule

    w_slab = jnp.zeros((f_pad + H1, 128), jnp.float32)
    w_slab = w_slab.at[:input_size, :H1].set(params["w1"])
    w_slab = w_slab.at[f_pad:f_pad + H1, :H2].set(params["w2"])

    b_slab = jnp.zeros((8, 128), jnp.float32)
    b_slab = b_slab.at[0, :H1].set(params["b1"].reshape(-1))
    b_slab = b_slab.at[1, :H2].set(params["b2"].reshape(-1))
    b_slab = b_slab.at[2, :H2].set(params["w3"].reshape(-1))      # fc3 weight row
    b_slab = b_slab.at[3, 0].set(params["b3"].reshape(())[()])    # fc3 bias scalar
    return w_slab, b_slab


# ---------------------------------------------------------------------------
# Forward wrapper.
# ---------------------------------------------------------------------------
@functools.partial(jax.jit, static_argnames=("tile_b",))
def co2_emission_forward(x, w_slab, b_slab, *, tile_b=2048):
    """x: (B, F) float32 -> (B, 1) float32 (same math as the PyTorch module)."""
    B, F = x.shape

    # Batch tile: multiple of 8 (f32 sublane granule), capped so the grid has
    # >= 2 steps when B allows it (v7x dual-TC), and by tile_b. No batch padding:
    # the trailing grid block is partial; its out-of-range rows are dropped.
    tile = min(tile_b, max(8, _round_up(pl.cdiv(B, 2), 8)))
    grid = (pl.cdiv(B, tile),)

    return pl.pallas_call(
        mlp_kernel,
        out_shape=jax.ShapeDtypeStruct((B, 1), jnp.float32),
        grid=grid,
        in_specs=[
            pl.BlockSpec((tile, F), lambda i: (i, 0)),        # activations: tiled over batch
            pl.BlockSpec(w_slab.shape, lambda i: (0, 0)),      # weights: VMEM-resident
            pl.BlockSpec(b_slab.shape, lambda i: (0, 0)),      # biases/w3: VMEM-resident
        ],
        out_specs=pl.BlockSpec((tile, 1), lambda i: (i, 0)),   # narrow real output column
        compiler_params=pltpu.CompilerParams(
            dimension_semantics=("parallel",),                 # megacore split on v7x
        ),
    )(x, w_slab, b_slab)


# ---------------------------------------------------------------------------
# Deterministic init mimicking PyTorch nn.Linear default (U(+-1/sqrt(fan_in))).
# ---------------------------------------------------------------------------
def init_params(key, input_size):
    def linear(key, fan_in, fan_out):
        kw, kb = jax.random.split(key)
        bound = 1.0 / jnp.sqrt(jnp.float32(fan_in))
        w = jax.random.uniform(kw, (fan_in, fan_out), jnp.float32, -bound, bound)
        b = jax.random.uniform(kb, (1, fan_out), jnp.float32, -bound, bound)
        return w, b

    k1, k2, k3 = jax.random.split(key, 3)
    w1, b1 = linear(k1, input_size, H1)
    w2, b2 = linear(k2, H1, H2)
    w3, b3 = linear(k3, H2, 1)
    return {"w1": w1, "b1": b1, "w2": w2, "b2": b2, "w3": w3, "b3": b3}


if __name__ == "__main__":
    key = jax.random.PRNGKey(0)
    k_x, k_p = jax.random.split(key)

    batch = 40          # not a multiple of the tile -> exercises the partial block
    input_size = 16     # stand-in for X_train.shape[1]

    x = jax.random.normal(k_x, (batch, input_size), dtype=jnp.float32)
    params = init_params(k_p, input_size)

    # Pack once (reused across calls).
    w_slab, b_slab = pack_params(params, input_size)

    out = jax.block_until_ready(co2_emission_forward(x, w_slab, b_slab))

    # Plain-JAX f32 reference (same math as the PyTorch f32 module).
    h = jnp.maximum(x @ params["w1"] + params["b1"], 0.0)
    h = jnp.maximum(h @ params["w2"] + params["b2"], 0.0)
    ref = h @ params["w3"] + params["b3"]

    assert out.shape == (batch, 1)
    max_err = jnp.max(jnp.abs(out - ref))
    assert jnp.allclose(out, ref, atol=2e-2, rtol=2e-2), f"max abs err = {max_err}"

    print("KERNEL_OK")
</pallas_src>

<mosaic_0001>
module attributes {stable_mosaic.version = 11 : i64} {
  func.func @mlp_kernel(%arg0: i32, %arg1: memref<24x16xf32, #tpu.memory_space<vmem>>, %arg2: memref<144x128xf32, #tpu.memory_space<vmem>>, %arg3: memref<8x128xf32, #tpu.memory_space<vmem>>, %arg4: memref<24x1xf32, #tpu.memory_space<vmem>>) attributes {dimension_semantics = [#tpu.dimension_semantics<parallel>], iteration_bounds = array<i64: 2>, scalar_prefetch = 0 : i64, scratch_operands = 0 : i64, tpu.core_type = #tpu.core_type<tc>, window_params = [{transform_indices = @transform_0, window_bounds = array<i64: 24, 16>}, {pipeline_mode = #tpu.pipeline_mode<synchronous>, transform_indices = @transform_1, window_bounds = array<i64: 144, 128>}, {pipeline_mode = #tpu.pipeline_mode<synchronous>, transform_indices = @transform_2, window_bounds = array<i64: 8, 128>}, {transform_indices = @transform_3, window_bounds = array<i64: 24, 1>}]} {
    %c0 = arith.constant 0 : index
    %c0_0 = arith.constant 0 : index
    %0 = vector.load %arg1[%c0, %c0_0] : memref<24x16xf32, #tpu.memory_space<vmem>>, vector<24x16xf32>
    %c0_1 = arith.constant 0 : index
    %c0_2 = arith.constant 0 : index
    %1 = vector.load %arg2[%c0_1, %c0_2] : memref<144x128xf32, #tpu.memory_space<vmem>>, vector<16x128xf32>
    %c16 = arith.constant 16 : index
    %c0_3 = arith.constant 0 : index
    %2 = vector.load %arg2[%c16, %c0_3] : memref<144x128xf32, #tpu.memory_space<vmem>>, vector<128x128xf32>
    %c0_4 = arith.constant 0 : index
    %c0_5 = arith.constant 0 : index
    %3 = vector.load %arg3[%c0_4, %c0_5] : memref<8x128xf32, #tpu.memory_space<vmem>>, vector<1x128xf32>
    %c1 = arith.constant 1 : index
    %c0_6 = arith.constant 0 : index
    %4 = vector.load %arg3[%c1, %c0_6] : memref<8x128xf32, #tpu.memory_space<vmem>>, vector<1x128xf32>
    %c2 = arith.constant 2 : index
    %c0_7 = arith.constant 0 : index
    %5 = vector.load %arg3[%c2, %c0_7] : memref<8x128xf32, #tpu.memory_space<vmem>>, vector<1x128xf32>
    %c3 = arith.constant 3 : index
    %c0_8 = arith.constant 0 : index
    %6 = vector.load %arg3[%c3, %c0_8] : memref<8x128xf32, #tpu.memory_space<vmem>>, vector<1x128xf32>
    %cst = arith.constant dense<0.000000e+00> : vector<1xf32>
    %7 = vector.multi_reduction <add>, %6, %cst [1] : vector<1x128xf32> to vector<1xf32>
    %8 = vector.shape_cast %7 : vector<1xf32> to vector<1x1xf32>
    %cst_9 = arith.constant dense<0.000000e+00> : vector<24x128xf32>
    %9 = tpu.matmul %0, %1, %cst_9 {dimension_numbers = #tpu.dot_dimension_numbers<[1], [0], [0], [1], [0, 0, 1, 1], [], []>} : vector<24x16xf32>, vector<16x128xf32>, vector<24x128xf32> -> vector<24x128xf32>
    %10 = vector.broadcast %3 : vector<1x128xf32> to vector<24x128xf32>
    %11 = arith.addf %9, %10 : vector<24x128xf32>
    %cst_10 = arith.constant 0.000000e+00 : f32
    %12 = vector.broadcast %cst_10 : f32 to vector<24x128xf32>
    %13 = arith.maximumf %11, %12 : vector<24x128xf32>
    %cst_11 = arith.constant dense<0.000000e+00> : vector<24x128xf32>
    %14 = tpu.matmul %13, %2, %cst_11 {dimension_numbers = #tpu.dot_dimension_numbers<[1], [0], [0], [1], [0, 0, 1, 1], [], []>} : vector<24x128xf32>, vector<128x128xf32>, vector<24x128xf32> -> vector<24x128xf32>
    %15 = vector.broadcast %4 : vector<1x128xf32> to vector<24x128xf32>
    %16 = arith.addf %14, %15 : vector<24x128xf32>
    %cst_12 = arith.constant 0.000000e+00 : f32
    %17 = vector.broadcast %cst_12 : f32 to vector<24x128xf32>
    %18 = arith.maximumf %16, %17 : vector<24x128xf32>
    %19 = vector.broadcast %5 : vector<1x128xf32> to vector<24x128xf32>
    %20 = arith.mulf %18, %19 : vector<24x128xf32>
    %cst_13 = arith.constant dense<0.000000e+00> : vector<24xf32>
    %21 = vector.multi_reduction <add>, %20, %cst_13 [1] : vector<24x128xf32> to vector<24xf32>
    %22 = vector.shape_cast %21 : vector<24xf32> to vector<24x1xf32>
    %23 = vector.broadcast %8 : vector<1x1xf32> to vector<24x1xf32>
    %24 = arith.addf %22, %23 : vector<24x1xf32>
    %c0_14 = arith.constant 0 : index
    %c0_15 = arith.constant 0 : index
    %25 = vector.load %arg4[%c0_14, %c0_15] : memref<24x1xf32, #tpu.memory_space<vmem>>, vector<24x1xf32>
    tpu.vector_store %arg4[%c0_14, %c0_15], %24 {strides = array<i32>} : memref<24x1xf32, #tpu.memory_space<vmem>>, vector<24x1xf32>,
    return
  }
  func.func @transform_0(%arg0: i32) -> (i32, i32) {
    %c0_i32 = arith.constant 0 : i32
    %c0_i32_0 = arith.constant 0 : i32
    return %arg0, %c0_i32 : i32, i32
  }
  func.func @transform_1(%arg0: i32) -> (i32, i32) {
    %c0_i32 = arith.constant 0 : i32
    %c0_i32_0 = arith.constant 0 : i32
    %c0_i32_1 = arith.constant 0 : i32
    return %c0_i32, %c0_i32_0 : i32, i32
  }
  func.func @transform_2(%arg0: i32) -> (i32, i32) {
    %c0_i32 = arith.constant 0 : i32
    %c0_i32_0 = arith.constant 0 : i32
    %c0_i32_1 = arith.constant 0 : i32
    return %c0_i32, %c0_i32_0 : i32, i32
  }
  func.func @transform_3(%arg0: i32) -> (i32, i32) {
    %c0_i32 = arith.constant 0 : i32
    %c0_i32_0 = arith.constant 0 : i32
    return %arg0, %c0_i32 : i32, i32
  }
}

</mosaic_0001>

<bundles_post_ra>
// kernel: co2_emission_forward.1
= control target key start
LH: loop header
LB: loop body
LE: loop exit
PB: predicated region body
PF: predicated region fallthrough
CT: control target
= control target key end

     0   :  { %8 = vsyncpa [#allocation3], 0  ;;  %s1084_s12 = smov 0   ;;  %s1086_s13 = smov 0   ;;  %s1242_s0 = inlined_call_operand.vmem [shape: f32[40,16], index: 0, kind: input, shape index: {}]   ;;  %s1243_s1 = inlined_call_operand.hbm [shape: f32[144,128], index: 1, kind: input, shape index: {}]   ;;  %s1244_s2 = inlined_call_operand.vmem [shape: f32[8,128], index: 2, kind: input, shape index: {}]   ;;  %s1245_s3 = inlined_call_operand.vmem [shape: f32[40,1], index: 3, kind: output, shape index: {}]  }
   0x1   :  { %s1088_s14 = smov 0  }
   0x2 LB: > { %s1097_s15 = sadd.s32 4294967295, %s1024_s14   ;;  %s1099_s16 = sadd.s32 1, %s1024_s14   ;;  %s1024_s14 = sphi %s1088_s14, %s1257_s14   ;;  %s1020_s13 = sphi %s1086_s13, %s1256_s13   ;;  %s1016_s12 = sphi %s1084_s12, %s1255_s12  }
   0x3   : > { %s86_s17 = ssub.s32 %s1024_s14, %s1099_s16  ;;  %s89_s18 = sadd.s32 1, %s1020_s13 }
   0x4   : > { %p87_p0 = scmp.eq.s32.totalorder %s86_s17, 0  ;;  %p99_p1 = scmp.ne.s32.totalorder %s1020_s13, %s1016_s12 }
   0x5   : > { %p100_p2 = scmp.eq.s32.totalorder %s1097_s15, 1  ;;  %p682_p3 = scmp.ge.s32.totalorder %s1024_s14, 1 }
   0x6   : > { %s1107_s19 = scalar_select %p87_p0, %s1020_s13, %s89_s18  }
   0x7   : > { %p1109_p4 = por %p100_p2, %p99_p1  ;;  %p113_p5 = scmp.lt.s32.totalorder %s1024_s14, 3 }
   0x8   : > { %p1246_p6 = scmp.eq.s32.totalorder %s1097_s15, 0  ;;  %s1058_s22 = smov [#allocation2]  }
   0x9   : > { %s1248_s20 = scalar_select %p1109_p4, 1, 0 }
   0xa   : > { %p1114_p7 = pnand %p682_p3, %p113_p5  ;;  %s125_s23 = sshll.u32 %s1058_s22, 4  ;;  %s126_s23 = int_to_ptr.vmem [resolvable:$true] %s125_s23 }
   0xb   : > { %s938_s27 = scalar_lea.hbm %s1243_s1, 2304 }
   0xc   : > { %s1249_s21 = scalar_select %p1114_p7, 1, 0 }
   0xd   : > { %p833_p8 = pneg %p1114_p7  ;;  %p939_p10 = scmp.ne.s32.totalorder %s1243_s1, %s938_s27 }
   0xe   : > { %p945_p0 = scmp.lt.u32.totalorder %s938_s27, %s1243_s1 }
   0xf   : > { %p1122_p9 = pnand %p1246_p6, %p833_p8 }
  0x11   : > { %p940_p11 = pneg %p1122_p9 }
  0x13   : > { %p941_p12 = pnand %p940_p11, %p939_p10 }
  0x15   : > { %p942_p13 = pneg %p941_p12 }
  0x17   : > { %p947_p1 = pnand %p945_p0, %p942_p13 }
  0x19   : > { %950 = shalt.err (!%p947_p1)
}
  0x1a   : > { %s951_s5 = scalar_lea.vmem %s126_s23, 2304  ;;  %p959_p8 = scmp.lt.s32.totalorder %s126_s23, %s126_s23 }
  0x1b   : > { %p952_p2 = scmp.ne.s32.totalorder %s126_s23, %s951_s5  ;;  %p960_p6 = scmp.lt.s32.totalorder %s951_s5, %s951_s5 }
  0x1d   : > { %p954_p3 = pnand %p952_p2, %p940_p11  ;;  %p961_p4 = por %p960_p6, %p959_p8 }
  0x1f   : > { %p955_p5 = pneg %p954_p3 }
  0x21   : > { %p962_p7 = pnand %p961_p4, %p955_p5 }
  0x23   : > { %965 = shalt.err (!%p962_p7)
}
  0x24   : > { %s1059_s6 = smov 128   ;;  %s1060_s7 = smov 8  }
  0x25   : > { %836 = dma.hbm_to_vmem [thread:$0]  (!%p1122_p9), %s1243_s1, 2304, %s126_s23, [#allocation3], %s1059_s6, %s1059_s6, %s1060_s7  }
  0x26   : > { %p1251_p10 = scmp.ne.s32.totalorder %s1249_s21, 0 }
  0x27   : > { %p1252_p12 = scmp.eq.s32.totalorder (!%p1251_p10), %s1097_s15, 0 }
  0x28   : > { %161 = sbr.rel (%p1251_p10) target bundleno = 705 (0x2c1), region = 32 }
  0x2f   : > { %1011 = dma.done.wait (%p1252_p12), [#allocation3], 2304   ;;  %p1253_p11 = pmov %p1252_p12 }
  0x30   : > { %s1149_s10 = smul.u32 3, %s1097_s15  ;;  %v1061_v0 = vmov 0.0|0.0   ;;  %vm1062_vm0 = vmmov 0   ;;  %v1063_v1 = vmov 0.0   ;;  %v210_v2 = vld [vmem:[#allocation2] sm:$0xff]  ;;  %v211_v3 = vld [vmem:[#allocation2 + $0x8] sm:$0xff] }
  0x31   : > { %1013 = vsyncadd (%p1253_p11), [#allocation3], 4294964992  ;;  %785 = vmatprep.subr.bf16.mxu0 %v1061_v0  ;;  %735 = vmatprep.mubr.msk.f32.mxu0 %vm1062_vm0, %v1063_v1  ;;  %v212_v4 = vld [vmem:[#allocation2 + $0x10] sm:$0xff]  ;;  %v786_v5 = vpack.c.bf16 %v211_v3, %v210_v2  ;;  %v213_v6 = vld [vmem:[#allocation2 + $0x18] sm:$0xff]  ;;  %vm240_vm1 = vcmask 130048   ;;  %vm232_vm2 = vcmask 1040384  }
  0x32   : > { %p193_p4 = scmp.lt.s32.totalorder %s1149_s10, 4  ;;  %812 = vmatprep.subr.bf16.mxu1 %v1061_v0  ;;  %779 = vmatprep.mubr.msk.f32.mxu1 %vm1062_vm0, %v1063_v1  ;;  %v789_v8 = vpack.c.bf16 %v213_v6, %v212_v4  ;;  %v214_v9 = vld [vmem:[#allocation2 + $0x20] sm:$0xff]  ;;  %v215_v10 = vld [vmem:[#allocation2 + $0x28] sm:$0xff]  ;;  %v216_v13 = vld [vmem:[#allocation2 + $0x30] sm:$0xff]  ;;  %s185_s30 = sand.u32 1, %s1016_s12   ;;  %vm440_vm3 = vcmask 7168  }
  0x33   : > { %787 = vmatpush3.bf16.msra.mxu0 %v786_v5  ;;  %v792_v12 = vpack.c.bf16 %v215_v10, %v214_v9  ;;  %v217_v14 = vld [vmem:[#allocation2 + $0x38] sm:$0xff]  ;;  %v218_v17 = vld [vmem:[#allocation2 + $0x40] sm:$0xff]  ;;  %v219_v18 = vld [vmem:[#allocation2 + $0x48] sm:$0xff]  ;;  %s828_s4 = smul.u32 24, %s185_s30  ;;  %p1254_p6 = scmp.ne.s32.totalorder %s1248_s20, 0 }
  0x34   : > { %s194_s11 = scalar_select %p193_p4, %s1149_s10, 4  ;;  %788 = vmatprep.subr.bf16.mxu0 %v1061_v0  ;;  %820 = vmatpush3.bf16.msra.mxu1 %v789_v8  ;;  %v795_v16 = vpack.c.bf16 %v217_v14, %v216_v13  ;;  %v798_v19 = vpack.c.bf16 %v219_v18, %v218_v17  ;;  %v220_v20 = vld [vmem:[#allocation2 + $0x50] sm:$0xff]  ;;  %v221_v21 = vld [vmem:[#allocation2 + $0x58] sm:$0xff]  ;;  %v222_v23 = vld [vmem:[#allocation2 + $0x60] sm:$0xff] }
  0x35   : > { %813 = vmatprep.subr.bf16.mxu1 %v1061_v0  ;;  %v801_v22 = vpack.c.bf16 %v221_v21, %v220_v20  ;;  %v223_v24 = vld [vmem:[#allocation2 + $0x68] sm:$0xff]  ;;  %v224_v26 = vld [vmem:[#allocation2 + $0x70] sm:$0xff]  ;;  %v225_v27 = vld [vmem:[#allocation2 + $0x78] sm:$0xff]  ;;  %s1201_s5 = scalar_lea.vmem [#allocation4], %s828_s4   ;;  %s452_s12 = ssub.s32 (%p1254_p6), 5, %s1149_s10 }
  0x36   : > { %s687_s14 = sshll.u32 %s194_s11, 3  ;;  %v804_v25 = vpack.c.bf16 %v223_v24, %v222_v23  ;;  %v807_v28 = vpack.c.bf16 %v225_v27, %v224_v26  ;;  %v226_v29 = vld [vmem:[#allocation2 + $0x80] sm:$0xff]  ;;  %v227_v30 = vld [vmem:[#allocation2 + $0x88] sm:$0xff]  ;;  %s706_s6 = smul.u32 (%p1254_p6), 24, %s1097_s15 }
  0x37   : > { %s196_s21 = scalar_lea.vmem %s1242_s0, %s687_s14  ;;  %v810_v31 = vpack.c.bf16 %v227_v30, %v226_v29  ;;  %v688_v32 = vld [vmem:[%s1244_s2] ss:$0 sm:$0xff]  ;;  %v231_v45 = vld [vmem:[%s1244_s2 + $0x3] sm:$0x1]  ;;  %v692_v47 = vld [vmem:[%s1244_s2 + $0x1] ss:$0 sm:$0xff] }
  0x38   : > { %v207_v7 = vld [vmem:[%s196_s21] sm:$0xff]  ;;  %v208_v11 = vld [vmem:[%s196_s21 + $0x8] sm:$0xff]  ;;  %821 = vmatpush3.bf16.msra.mxu1 %v792_v12  ;;  %v209_v15 = vld [vmem:[%s196_s21 + $0x10] sm:$0xff]  ;;  %v233_v46 = vsel %vm232_vm2, %v231_v45, 0.0  ;;  %p453_p7 = scmp.lt.s32.totalorder (%p1254_p6), %s452_s12, 3  ;;  %s1213_s9 = scalar_lea.vmem (%p1254_p6), %s1245_s3, %s706_s6  }
  0x39   : > { %736 = vmatmul.mubr.msk.f32.vlgmr.msra.gmra.mrb[0].mxu0 %vm240_vm1, %v207_v7  ;;  %814 = vmatprep.subr.bf16.mxu1 %v1061_v0  ;;  %v693_v51 = vld [vmem:[%s1244_s2 + $0x2] ss:$0 sm:$0xff] }
  0x3a   : > { %738 = vmatprep.mubr.msk.f32.mxu0 %vm1062_vm0, %v1063_v1  ;;  %790 = vmatpush3.bf16.msra.mxu0 %v789_v8 }
  0x3b   : > { %791 = vmatprep.subr.bf16.mxu0 %v1061_v0  ;;  %234 = vadd.xlane.f32.xlu0 %v233_v46 }
  0x3c   : > { %822 = vmatpush3.bf16.msra.mxu1 %v795_v16 }
  0x3d   : > { %739 = vmatmul.mubr.msk.f32.gmra.mrb[2].mxu0 %vm240_vm1, %v208_v11  ;;  %815 = vmatprep.subr.bf16.mxu1 %v1061_v0 }
  0x3e   : > { %741 = vmatprep.mubr.msk.f32.mxu0 %vm1062_vm0, %v1063_v1  ;;  %793 = vmatpush3.bf16.msra.mxu0 %v792_v12 }
  0x3f   : > { %794 = vmatprep.subr.bf16.mxu0 %v1061_v0 }
  0x40   : > { %823 = vmatpush3.bf16.msra.mxu1 %v798_v19 }
  0x41   : > { %742 = vmatmul.mubr.msk.f32.gmra.mrb[4].mxu0 %vm240_vm1, %v209_v15  ;;  %816 = vmatprep.subr.bf16.mxu1 %v1061_v0 }
  0x42   : > { %796 = vmatpush3.bf16.msra.mxu0 %v795_v16  ;;  %776 = vmatprep.mubr.msk.f32.mxu0 %vm1062_vm0, %v1063_v1 }
  0x43   : > { %797 = vmatprep.subr.bf16.mxu0 %v1061_v0 }
  0x44   : > { %824 = vmatpush3.bf16.msra.mxu1 %v801_v22 }
  0x45   : > { %817 = vmatprep.subr.bf16.mxu1 %v1061_v0 }
  0x46   : > { %799 = vmatpush3.bf16.msra.mxu0 %v798_v19 }
  0x47   : > { %800 = vmatprep.subr.bf16.mxu0 %v1061_v0 }
  0x48   : > { %825 = vmatpush3.bf16.msra.mxu1 %v804_v25 }
  0x49   : > { %818 = vmatprep.subr.bf16.mxu1 %v1061_v0 }
  0x4a   : > { %802 = vmatpush3.bf16.msra.mxu0 %v801_v22 }
  0x4b   : > { %803 = vmatprep.subr.bf16.mxu0 %v1061_v0 }
  0x4c   : > { %826 = vmatpush3.bf16.msra.mxu1 %v807_v28 }
  0x4d   : > { %819 = vmatprep.subr.bf16.mxu1 %v1061_v0 }
  0x4e   : > { %805 = vmatpush3.bf16.msra.mxu0 %v804_v25 }
  0x4f   : > { %806 = vmatprep.subr.bf16.mxu0 %v1061_v0 }
  0x50   : > { %827 = vmatpush3.bf16.msra.mxu1 %v810_v31 }
  0x52   : > { %808 = vmatpush3.bf16.msra.mxu0 %v807_v28 }
  0x53   : > { %809 = vmatprep.subr.bf16.mxu0 %v1061_v0  ;;  %v433_v0 = vlaneseq }
  0x56   : > { %811 = vmatpush3.bf16.msra.mxu0 %v810_v31 }
  0xc8   : > { %v235_v3 = vpop.xlane.xlu0 %234 }
 0x10c   : > { %v316_v33 = vpop.f32.mrb[0].mxu0 }
 0x10d   : > { %v317_v34 = vadd.f32 %v688_v32, %v316_v33  ;;  %v737_v35 = vpop.f32.mrb[1].mxu0 }
 0x10f   : > { %v330_v36 = vmax.f32 %v317_v34, 0.0 }
 0x110   : > { %v321_v37 = vpop.f32.mrb[2].mxu0 }
 0x111   : > { %v322_v38 = vadd.f32 %v688_v32, %v321_v37  ;;  %v740_v39 = vpop.f32.mrb[3].mxu0  ;;  %777 = vmatmul.mubr.f32.vlgmr.msra.gmra.mrb[6].mxu0 %v330_v36 }
 0x113   : > { %v331_v40 = vmax.f32 %v322_v38, 0.0 }
 0x114   : > { %v326_v41 = vpop.f32.mrb[4].mxu0 }
 0x115   : > { %v327_v42 = vadd.f32 %v688_v32, %v326_v41  ;;  %v743_v43 = vpop.f32.mrb[5].mxu0  ;;  %780 = vmatmul.mubr.f32.vlgmr.msra.gmra.mrb[0].mxu1 %v331_v40 }
 0x116   : > { %782 = vmatprep.mubr.msk.f32.mxu1 %vm1062_vm0, %v1063_v1  ;;  %v434_v1 = vshrl.u32 %v433_v0, 7 }
 0x117   : > { %v332_v44 = vmax.f32 %v327_v42, 0.0 }
 0x118   : > { %v435_v2 = vsub.s32 0, %v434_v1 }
 0x119   : > { %783 = vmatmul.mubr.f32.gmra.mrb[2].mxu1 %v332_v44 }
 0x11a   : > { %v436_v4 = vrot.slane %v235_v3, %v435_v2 }
 0x1e4   : > { %v403_v48 = vpop.f32.mrb[6].mxu0 }
 0x1e5   : > { %v404_v49 = vadd.f32 %v692_v47, %v403_v48  ;;  %v778_v50 = vpop.f32.mrb[7].mxu0 }
 0x1e7   : > { %v417_v52 = vmax.f32 %v404_v49, 0.0 }
 0x1e8   : > { %v408_v53 = vpop.f32.mrb[0].mxu1 }
 0x1e9   : > { %v409_v54 = vadd.f32 %v692_v47, %v408_v53  ;;  %v781_v55 = vpop.f32.mrb[1].mxu1  ;;  %v424_v56 = vmul.f32 %v693_v51, %v417_v52 }
 0x1eb   : > { %v418_v57 = vmax.f32 %v409_v54, 0.0  ;;  %427 = vadd.xlane.f32.xlu0 %v424_v56 }
 0x1ec   : > { %v413_v58 = vpop.f32.mrb[2].mxu1 }
 0x1ed   : > { %v414_v59 = vadd.f32 %v692_v47, %v413_v58  ;;  %v784_v60 = vpop.f32.mrb[3].mxu1  ;;  %v425_v61 = vmul.f32 %v693_v51, %v418_v57 }
 0x1ef   : > { %v419_v62 = vmax.f32 %v414_v59, 0.0  ;;  %429 = vadd.xlane.f32.xlu1 %v425_v61 }
 0x1f1   : > { %v426_v63 = vmul.f32 %v693_v51, %v419_v62 }
 0x1f3   : > { %431 = vadd.xlane.f32.xlu1 %v426_v63 }
 0x278   : > { %v428_v5 = vpop.xlane.xlu0 %427 }
 0x279   : > { %v437_v6 = vadd.f32 %v436_v4, %v428_v5 }
 0x27b   : > { %441 = vst.msk [vmem:[%s1201_s5] sm:$0xff] %vm440_vm3, %v437_v6 }
 0x27c   : > { %v430_v7 = vpop.xlane.xlu1 %429 }
 0x27d   : > { %v438_v8 = vadd.f32 %v436_v4, %v430_v7  ;;  %450 = sbr.rel (!%p1254_p6) target bundleno = 705 (0x2c1), region = 40 }
 0x27f   : > { %442 = vst.msk [vmem:[%s1201_s5 + $0x8] sm:$0xff] %vm440_vm3, %v438_v8 }
 0x280   : > { %v432_v9 = vpop.xlane.xlu1 %431 }
 0x281   : > { %v439_v10 = vadd.f32 %v436_v4, %v432_v9 }
 0x283   : > { %443 = vst.msk [vmem:[%s1201_s5 + $0x10] sm:$0xff] %vm440_vm3, %v439_v10 }
 0x284   : > { %s1259_s12 = smov (!%p453_p7, %s452_s12), 3 }
 0x285   : > { %s694_s11 = sshll.u32 %s1259_s12, 7 }
 0x286   : > { %p697_p9 = scmp.eq.s32.totalorder %s694_s11, 0 }
 0x287   : > { %934 = sdivrem.u32 (!%p697_p9), %s1259_s12, 3 }
 0x288   : > { %461 = sbr.rel (%p697_p9) target bundleno = 705 (0x2c1), region = 44 }
 0x290   : > { %s1219_s20 = spop.drf %934 }
 0x291   : > { %p698_p13 = scmp.le.s32.totalorder %s1219_s20, 0 }
 0x292   : > { %s1026_s15 = smov (!%p698_p13), %s1213_s9   ;;  %s1030_s10 = smov (!%p698_p13), %s1201_s5  }
 0x293   : > { %628 = sbr.rel (%p698_p13) target bundleno = 676 (0x2a4), region = 121  ;;  %s1034_s14 = smov (!%p698_p13), 0  }
 0x294   : > { %s1038_s17 = smov (!%p698_p13), 0  }
 0x29a LB: >> { %v529_v11 = vld [vmem:[%s1032_s10] sm:$0xff]  ;;  %v531_v12 = vld [vmem:[%s1032_s10 + $0x8] sm:$0xff]  ;;  %v533_v13 = vld [vmem:[%s1032_s10 + $0x10] sm:$0xff]  ;;  %s535_s18 = sadd.s32 1, %s1036_s14  ;;  %s523_s17 = sadd.s32 1, %s1040_s17   ;;  %s1040_s17 = sphi %s1038_s17, %s523_s17   ;;  %s1036_s14 = sphi %s1034_s14, %s1035_s14   ;;  %s1032_s10 = sphi %s1030_s10, %s540_s10   ;;  %s1028_s15 = sphi %s1026_s15, %s541_s15  }
 0x29b   : >> { %530 = vst [vmem:[%s1028_s15] sm:$0xff] %v529_v11  ;;  %532 = vst [vmem:[%s1028_s15 + $0x8] sm:$0xff] %v531_v12  ;;  %p536_p0 = scmp.ge.s32.totalorder %s535_s18, %s1219_s20  ;;  %p522_p1 = scmp.ge.s32.totalorder %s523_s17, %s1219_s20 }
 0x29c   : >> { %534 = vst [vmem:[%s1028_s15 + $0x10] sm:$0xff] %v533_v13 }
 0x29d   : >> { %s1261_s18 = smov (%p536_p0, %s535_s18), 0  ;;  %525 = sbr.rel (!%p522_p1) target bundleno = 666 (0x29a), region = 127 }
 0x29e   : >> { %s538_s21 = smul.u32 24, %s1261_s18  ;;  %s1035_s14 = smov %s1261_s18  }
 0x2a0   : >> { %s540_s10 = scalar_lea.vmem %s1201_s5, %s538_s21 [#allocation4]   ;;  %s541_s15 = scalar_lea.vmem %s1213_s9, %s538_s21  }
 0x2a4 PF: > { %936 = sdivrem.u32 %s1259_s12, 3 }
 0x2a5   : > { %s699_s22 = smul.u32 24, %s1219_s20 }
 0x2a7   : > { %s546_s23 = scalar_lea.vmem %s1201_s5, %s699_s22 [#allocation4]   ;;  %s548_s24 = scalar_lea.vmem %s1213_s9, %s699_s22  }
 0x2ad   : > { %s937_s25 = spop.drf %936 }
 0x2ae   : > { %p701_p2 = scmp.le.s32.totalorder %s937_s25, 0 }
 0x2af   : > { %s1042_s26 = smov (!%p701_p2), %s548_s24   ;;  %s1046_s27 = smov (!%p701_p2), %s546_s23  }
 0x2b0   : > { %642 = sbr.rel (%p701_p2) target bundleno = 705 (0x2c1), region = 132  ;;  %s1050_s28 = smov (!%p701_p2), 0  }
 0x2b1   : > { %s1054_s29 = smov (!%p701_p2), 0  }
 0x2b7 LB: >> { %v558_v14 = vld [vmem:[%s1048_s27] sm:$0xff]  ;;  %s560_s30 = sadd.s32 1, %s1052_s28  ;;  %s552_s29 = sadd.s32 1, %s1056_s29   ;;  %s1056_s29 = sphi %s1054_s29, %s552_s29   ;;  %s1052_s28 = sphi %s1050_s28, %s1051_s28   ;;  %s1048_s27 = sphi %s1046_s27, %s565_s27   ;;  %s1044_s26 = sphi %s1042_s26, %s566_s26  }
 0x2b8   : >> { %559 = vst [vmem:[%s1044_s26] sm:$0xff] %v558_v14  ;;  %p561_p3 = scmp.ge.s32.totalorder %s560_s30, %s937_s25  ;;  %p551_p5 = scmp.ge.s32.totalorder %s552_s29, %s937_s25 }
 0x2ba   : >> { %s1263_s30 = smov (%p561_p3, %s560_s30), 0  ;;  %554 = sbr.rel (!%p551_p5) target bundleno = 695 (0x2b7), region = 138 }
 0x2bb   : >> { %s702_s4 = sshll.u32 %s1263_s30, 3  ;;  %s1051_s28 = smov %s1263_s30  }
 0x2bc   : >> { %s565_s27 = scalar_lea.vmem %s546_s23, %s702_s4 [#allocation4]   ;;  %s566_s26 = scalar_lea.vmem %s548_s24, %s702_s4  }
 0x2c1 PF: > { %p11_p8 = scmp.ge.s32.totalorder %s1099_s16, 4   ;;  %s1255_s12 = smov %s1020_s13 }
 0x2c2   : > { %s1256_s13 = smov %s1107_s19  ;;  %s1257_s14 = smov %s1099_s16 }
 0x2c3   :  { %13 = sbr.rel (!%p11_p8) target bundleno = 2 (0x2), region = 149 }
 0x2ca   :  { %582 = vsyncpa [#allocation3], 1 }
 0x2cb   :  { %584 = vsyncpa [#allocation3 + $0x1], 1 }

</bundles_post_ra>
